<compile_context>
chip_gen: v7x
topology: tpu7x:2x2x1
jax: 0.10.0
libtpu: 0.0.40
codegen_flags: <defaults>
</compile_context>

<pallas_src>
import math

import jax
import jax.numpy as jnp
from jax.experimental import pallas as pl
from jax.experimental.pallas import tpu as pltpu


def _make_kernel(has_mask, return_weights):
    """Build a kernel with the exact positional signature for this config."""

    def _compute(q_ref, k_ref, v_ref, vl_ref, o_ref, w_ref):
        q = q_ref[...]                      # (TB, Q, D) in VMEM
        k = k_ref[...]                      # (TB, K, D)
        v = v_ref[...]                      # (TB, K, V)
        d = q.shape[-1]

        # Fold 1/sqrt(d) into q (touches Q*D elements, not Q*K scores).  The
        # Python-float scalar keeps q's dtype (bf16 inputs stay bf16).
        q = q * (1.0 / math.sqrt(d))

        # scores[b, i, j] = <q[b, i, :], k[b, j, :]> -- contraction on the
        # last dims of both operands (no transpose); f32 MXU accumulation.
        scores = jnp.einsum("bqd,bkd->bqk", q, k,
                            preferred_element_type=jnp.float32)

        if has_mask:
            # (TB, Q, 1) int32 block vs. a key-index iota: a single compare
            # + select over the whole scores tile.
            col = jax.lax.broadcasted_iota(jnp.int32, scores.shape, 2)
            vl = vl_ref[...]
            # -1e6 (not -inf): matches the PyTorch reference so fully masked
            # rows degrade to a uniform distribution.
            scores = jnp.where(col < vl, scores, jnp.float32(-1e6))

        # Softmax over the key axis (f32).
        m = jnp.max(scores, axis=-1, keepdims=True)
        e = jnp.exp(scores - m)
        s = jnp.sum(e, axis=-1, keepdims=True)
        # Exact reciprocal when the weights are consumed downstream; approx
        # (EUP slot, off the VPU hot path) otherwise.
        w = e * pl.reciprocal(s, approx=not return_weights)

        if w_ref is not None:
            w_ref[...] = w.astype(w_ref.dtype)

        p = w.astype(v.dtype)
        out = jnp.einsum("bqk,bkv->bqv", p, v,
                         preferred_element_type=jnp.float32)
        # NOTE: dropout is identity in eval mode / p=0.0.
        o_ref[...] = out.astype(o_ref.dtype)

    if has_mask:
        if return_weights:
            def kernel(q_ref, k_ref, v_ref, vl_ref, o_ref, w_ref):
                _compute(q_ref, k_ref, v_ref, vl_ref, o_ref, w_ref)
        else:
            def kernel(q_ref, k_ref, v_ref, vl_ref, o_ref):
                _compute(q_ref, k_ref, v_ref, vl_ref, o_ref, None)
    else:
        if return_weights:
            def kernel(q_ref, k_ref, v_ref, o_ref, w_ref):
                _compute(q_ref, k_ref, v_ref, None, o_ref, w_ref)
        else:
            def kernel(q_ref, k_ref, v_ref, o_ref):
                _compute(q_ref, k_ref, v_ref, None, o_ref, None)
    return kernel


def _vmem_capacity_bytes():
    try:
        return int(pltpu.get_tpu_info().vmem_capacity_bytes)
    except Exception:
        return 64 << 20          # conservative (v7x-sized) fallback


def _choose_block_batch(batch, q_len, k_len, d, v_dim, with_weights,
                        dtype_bytes, vmem_budget_bytes):
    """Pick how many batch elements to pack per grid step."""
    # Enough rows per step to amortize the ~0.35us/step overhead ...
    tb = min(batch, max(1, -(-256 // q_len)))
    # ... but keep >= 2 grid steps so the "parallel" batch axis can shard
    # across the two v7x TensorCores (no effect on single-TC v5e/v6e).
    if batch >= 2:
        tb = min(tb, batch // 2)
    tb = max(tb, 1)

    def step_bytes(t):
        # Double-buffered input/output tiles ...
        io = t * (q_len * d + k_len * d + k_len * v_dim + q_len * v_dim
                  + (q_len * k_len if with_weights else 0))
        # ... plus live f32 intermediates (scores, exp, weights copies).
        inter = 3 * t * q_len * k_len * 4
        return 2 * io * dtype_bytes + inter

    while tb > 1 and step_bytes(tb) > vmem_budget_bytes:
        tb //= 2
    # Make TB a divisor of the batch so the grid tiles exactly.
    while batch % tb:
        tb -= 1
    return max(tb, 1)


def dot_product_attention(queries, keys, values, valid_lens=None, *,
                          return_attention_weights=False, block_batch=None):
    """d2l DotProductAttention.forward (eval mode) as a Pallas TPU kernel.

    queries: (B, Q, D), keys: (B, K, D), values: (B, K, V)
    valid_lens: None, (B,) or (B, Q)

    For the v6e/v7x MXU fast path pass bf16 q/k/v end-to-end (halves HBM DMA
    bytes and VMEM tile sizes); softmax math is always f32.  Output (and the
    optional (B, Q, K) attention weights) are written in queries.dtype.
    """
    b, q_len, d = queries.shape
    bk, k_len, dk = keys.shape
    bv, kv_len, v_dim = values.shape
    assert (bk, dk) == (b, d) and (bv, kv_len) == (b, k_len)

    # Generation-aware VMEM sizing (~48 MiB limit on v7x, ~96 MiB on v5e/v6e).
    vmem_cap = _vmem_capacity_bytes()
    vmem_limit = int(min(vmem_cap * 3 // 4, vmem_cap - (8 << 20)))
    vmem_budget = (vmem_limit * 4) // 5

    dtype_bytes = jnp.dtype(queries.dtype).itemsize
    tb = block_batch or _choose_block_batch(
        b, q_len, k_len, d, v_dim, return_attention_weights,
        dtype_bytes, vmem_budget)
    assert b % tb == 0
    grid = (b // tb,)

    idx3 = lambda i: (i, 0, 0)
    in_specs = [
        pl.BlockSpec((tb, q_len, d), idx3),        # queries
        pl.BlockSpec((tb, k_len, d), idx3),        # keys
        pl.BlockSpec((tb, k_len, v_dim), idx3),    # values
    ]
    args = [queries, keys, values]

    has_mask = valid_lens is not None
    if has_mask:
        if valid_lens.ndim == 1:
            vl = jnp.broadcast_to(valid_lens.astype(jnp.int32)[:, None],
                                  (b, q_len))
        else:
            vl = valid_lens.astype(jnp.int32).reshape(b, q_len)
        vl = vl.reshape(b, q_len, 1)               # tiny (B, Q, 1) VMEM input
        in_specs.append(pl.BlockSpec((tb, q_len, 1), idx3))
        args.append(vl)

    if return_attention_weights:
        out_specs = (pl.BlockSpec((tb, q_len, v_dim), idx3),
                     pl.BlockSpec((tb, q_len, k_len), idx3))
        out_shape = (jax.ShapeDtypeStruct((b, q_len, v_dim), queries.dtype),
                     jax.ShapeDtypeStruct((b, q_len, k_len), queries.dtype))
    else:
        out_specs = pl.BlockSpec((tb, q_len, v_dim), idx3)
        out_shape = jax.ShapeDtypeStruct((b, q_len, v_dim), queries.dtype)

    # Advisory cost estimate for XLA scheduling around the custom call.
    flops = 2 * b * q_len * k_len * (d + v_dim)
    out_bytes = b * q_len * v_dim * dtype_bytes
    if return_attention_weights:
        out_bytes += b * q_len * k_len * dtype_bytes
    in_bytes = sum(int(a.size) * jnp.dtype(a.dtype).itemsize for a in args)
    cost = pl.CostEstimate(flops=flops,
                           transcendentals=b * q_len * k_len,
                           bytes_accessed=in_bytes + out_bytes)

    kernel = _make_kernel(has_mask, return_attention_weights)

    return pl.pallas_call(
        kernel,
        grid=grid,
        in_specs=in_specs,
        out_specs=out_specs,
        out_shape=out_shape,
        compiler_params=pltpu.CompilerParams(
            dimension_semantics=("parallel",),
            vmem_limit_bytes=vmem_limit),
        cost_estimate=cost,
    )(*args)


def _reference(queries, keys, values, valid_lens):
    """Pure-JAX reference mirroring the PyTorch code (f32)."""
    d = queries.shape[-1]
    q = queries.astype(jnp.float32)
    k = keys.astype(jnp.float32)
    v = values.astype(jnp.float32)
    scores = jnp.einsum("bqd,bkd->bqk", q, k) / math.sqrt(d)
    b, q_len, k_len = scores.shape
    if valid_lens is None:
        vl = jnp.full((b, q_len), k_len, dtype=jnp.float32)
    elif valid_lens.ndim == 1:
        vl = jnp.broadcast_to(valid_lens.astype(jnp.float32)[:, None],
                              (b, q_len))
    else:
        vl = valid_lens.astype(jnp.float32).reshape(b, q_len)
    col = jnp.arange(k_len, dtype=jnp.float32)[None, None, :]
    scores = jnp.where(col < vl[:, :, None], scores, -1e6)
    w = jax.nn.softmax(scores, axis=-1)
    return jnp.einsum("bqk,bkv->bqv", w, v), w


if __name__ == "__main__":
    key = jax.random.PRNGKey(0)
    kq, kk, kv, kl = jax.random.split(key, 4)

    B, Q, K, D, V = 4, 8, 16, 32, 32
    queries = jax.random.normal(kq, (B, Q, D), dtype=jnp.float32)
    keys_ = jax.random.normal(kk, (B, K, D), dtype=jnp.float32)
    values = jax.random.normal(kv, (B, K, V), dtype=jnp.float32)
    valid_lens_1d = jnp.array([3, 12, 16, 7], dtype=jnp.int32)
    valid_lens_2d = jax.random.randint(kl, (B, Q), 1, K + 1, dtype=jnp.int32)

    # 1) f32, per-batch valid_lens, with attention weights.
    out, attn_w = dot_product_attention(queries, keys_, values, valid_lens_1d,
                                        return_attention_weights=True)
    out = jax.block_until_ready(out)
    attn_w = jax.block_until_ready(attn_w)
    ref_out, ref_w = _reference(queries, keys_, values, valid_lens_1d)
    assert jnp.allclose(out, ref_out, atol=2e-2, rtol=2e-2), "1d output mismatch"
    assert jnp.allclose(attn_w, ref_w, atol=2e-2, rtol=2e-2), "1d weights mismatch"

    # 2) f32, per-row (2-D) valid_lens, output only (no weights writeback).
    out2 = dot_product_attention(queries, keys_, values, valid_lens_2d)
    out2 = jax.block_until_ready(out2)
    ref_out2, _ = _reference(queries, keys_, values, valid_lens_2d)
    assert jnp.allclose(out2, ref_out2, atol=2e-2, rtol=2e-2), "2d output mismatch"

    # 3) f32, no masking.
    out3 = dot_product_attention(queries, keys_, values, None)
    out3 = jax.block_until_ready(out3)
    ref_out3, _ = _reference(queries, keys_, values, None)
    assert jnp.allclose(out3, ref_out3, atol=2e-2, rtol=2e-2), "no-mask mismatch"

    # 4) native bf16 inputs end-to-end (v6e/v7x fast path), f32 accumulation.
    q_bf = queries.astype(jnp.bfloat16)
    k_bf = keys_.astype(jnp.bfloat16)
    v_bf = values.astype(jnp.bfloat16)
    out4 = dot_product_attention(q_bf, k_bf, v_bf, valid_lens_1d)
    out4 = jax.block_until_ready(out4)
    assert jnp.allclose(out4.astype(jnp.float32), ref_out,
                        atol=1e-1, rtol=1e-1), "bf16 mismatch"

    print("KERNEL_OK")
</pallas_src>

<mosaic_0001>
module attributes {stable_mosaic.version = 11 : i64} {
  func.func @kernel(%arg0: i32, %arg1: memref<2x8x32xf32, #tpu.memory_space<vmem>>, %arg2: memref<2x16x32xf32, #tpu.memory_space<vmem>>, %arg3: memref<2x16x32xf32, #tpu.memory_space<vmem>>, %arg4: memref<2x8x1xi32, #tpu.memory_space<vmem>>, %arg5: memref<2x8x32xf32, #tpu.memory_space<vmem>>, %arg6: memref<2x8x16xf32, #tpu.memory_space<vmem>>) attributes {dimension_semantics = [#tpu.dimension_semantics<parallel>], iteration_bounds = array<i64: 2>, scalar_prefetch = 0 : i64, scratch_operands = 0 : i64, tpu.core_type = #tpu.core_type<tc>, window_params = [{transform_indices = @transform_0, window_bounds = array<i64: 2, 8, 32>}, {transform_indices = @transform_1, window_bounds = array<i64: 2, 16, 32>}, {transform_indices = @transform_2, window_bounds = array<i64: 2, 16, 32>}, {transform_indices = @transform_3, window_bounds = array<i64: 2, 8, 1>}, {transform_indices = @transform_4, window_bounds = array<i64: 2, 8, 32>}, {transform_indices = @transform_5, window_bounds = array<i64: 2, 8, 16>}]} {
    %c0 = arith.constant 0 : index
    %c0_0 = arith.constant 0 : index
    %c0_1 = arith.constant 0 : index
    %0 = vector.load %arg1[%c0, %c0_0, %c0_1] : memref<2x8x32xf32, #tpu.memory_space<vmem>>, vector<2x8x32xf32>
    %c0_2 = arith.constant 0 : index
    %c0_3 = arith.constant 0 : index
    %c0_4 = arith.constant 0 : index
    %1 = vector.load %arg2[%c0_2, %c0_3, %c0_4] : memref<2x16x32xf32, #tpu.memory_space<vmem>>, vector<2x16x32xf32>
    %c0_5 = arith.constant 0 : index
    %c0_6 = arith.constant 0 : index
    %c0_7 = arith.constant 0 : index
    %2 = vector.load %arg3[%c0_5, %c0_6, %c0_7] : memref<2x16x32xf32, #tpu.memory_space<vmem>>, vector<2x16x32xf32>
    %cst = arith.constant 0.176776692 : f32
    %3 = vector.broadcast %cst : f32 to vector<2x8x32xf32>
    %4 = arith.mulf %0, %3 : vector<2x8x32xf32>
    "tpu.trace_start"() <{level = 10 : i32, message = "bqd,bkd->bqk"}> : () -> ()
    %cst_8 = arith.constant dense<0.000000e+00> : vector<2x8x16xf32>
    %5 = tpu.matmul %4, %1, %cst_8 {dimension_numbers = #tpu.dot_dimension_numbers<[2], [2], [1], [1], [0, 0, 0, 1, 1, 1], [0], [0]>} : vector<2x8x32xf32>, vector<2x16x32xf32>, vector<2x8x16xf32> -> vector<2x8x16xf32>
    "tpu.trace_stop"() : () -> ()
    %6 = tpu.iota {dimensions = array<i32: 2>} : vector<2x8x16xi32>
    %c0_9 = arith.constant 0 : index
    %c0_10 = arith.constant 0 : index
    %c0_11 = arith.constant 0 : index
    %7 = vector.load %arg4[%c0_9, %c0_10, %c0_11] : memref<2x8x1xi32, #tpu.memory_space<vmem>>, vector<2x8x1xi32>
    %8 = vector.broadcast %7 : vector<2x8x1xi32> to vector<2x8x16xi32>
    %9 = arith.cmpi slt, %6, %8 : vector<2x8x16xi32>
    %cst_12 = arith.constant -1.000000e+06 : f32
    %10 = vector.broadcast %cst_12 : f32 to vector<2x8x16xf32>
    %11 = arith.select %9, %5, %10 : vector<2x8x16xi1>, vector<2x8x16xf32>
    %cst_13 = arith.constant dense<0xFF800000> : vector<2x8xf32>
    %12 = vector.multi_reduction <maximumf>, %11, %cst_13 [2] : vector<2x8x16xf32> to vector<2x8xf32>
    %13 = vector.shape_cast %12 : vector<2x8xf32> to vector<2x8x1xf32>
    %14 = vector.broadcast %13 : vector<2x8x1xf32> to vector<2x8x16xf32>
    %15 = arith.subf %11, %14 : vector<2x8x16xf32>
    %16 = math.exp %15 : vector<2x8x16xf32>
    %cst_14 = arith.constant dense<0.000000e+00> : vector<2x8xf32>
    %17 = vector.multi_reduction <add>, %16, %cst_14 [2] : vector<2x8x16xf32> to vector<2x8xf32>
    %18 = vector.shape_cast %17 : vector<2x8xf32> to vector<2x8x1xf32>
    %19 = tpu.reciprocal %18 : vector<2x8x1xf32> -> vector<2x8x1xf32>
    %20 = vector.broadcast %19 : vector<2x8x1xf32> to vector<2x8x16xf32>
    %21 = arith.mulf %16, %20 : vector<2x8x16xf32>
    %c0_15 = arith.constant 0 : index
    %c0_16 = arith.constant 0 : index
    %c0_17 = arith.constant 0 : index
    %22 = vector.load %arg6[%c0_15, %c0_16, %c0_17] : memref<2x8x16xf32, #tpu.memory_space<vmem>>, vector<2x8x16xf32>
    tpu.vector_store %arg6[%c0_15, %c0_16, %c0_17], %21 {strides = array<i32>} : memref<2x8x16xf32, #tpu.memory_space<vmem>>, vector<2x8x16xf32>,
    "tpu.trace_start"() <{level = 10 : i32, message = "bqk,bkv->bqv"}> : () -> ()
    %cst_18 = arith.constant dense<0.000000e+00> : vector<2x8x32xf32>
    %23 = tpu.matmul %21, %2, %cst_18 {dimension_numbers = #tpu.dot_dimension_numbers<[2], [1], [1], [2], [0, 0, 0, 1, 1, 2], [0], [0]>} : vector<2x8x16xf32>, vector<2x16x32xf32>, vector<2x8x32xf32> -> vector<2x8x32xf32>
    "tpu.trace_stop"() : () -> ()
    %c0_19 = arith.constant 0 : index
    %c0_20 = arith.constant 0 : index
    %c0_21 = arith.constant 0 : index
    %24 = vector.load %arg5[%c0_19, %c0_20, %c0_21] : memref<2x8x32xf32, #tpu.memory_space<vmem>>, vector<2x8x32xf32>
    tpu.vector_store %arg5[%c0_19, %c0_20, %c0_21], %23 {strides = array<i32>} : memref<2x8x32xf32, #tpu.memory_space<vmem>>, vector<2x8x32xf32>,
    return
  }
  func.func @transform_0(%arg0: i32) -> (i32, i32, i32) {
    %c0_i32 = arith.constant 0 : i32
    %c0_i32_0 = arith.constant 0 : i32
    %c0_i32_1 = arith.constant 0 : i32
    return %arg0, %c0_i32, %c0_i32_0 : i32, i32, i32
  }
  func.func @transform_1(%arg0: i32) -> (i32, i32, i32) {
    %c0_i32 = arith.constant 0 : i32
    %c0_i32_0 = arith.constant 0 : i32
    %c0_i32_1 = arith.constant 0 : i32
    return %arg0, %c0_i32, %c0_i32_0 : i32, i32, i32
  }
  func.func @transform_2(%arg0: i32) -> (i32, i32, i32) {
    %c0_i32 = arith.constant 0 : i32
    %c0_i32_0 = arith.constant 0 : i32
    %c0_i32_1 = arith.constant 0 : i32
    return %arg0, %c0_i32, %c0_i32_0 : i32, i32, i32
  }
  func.func @transform_3(%arg0: i32) -> (i32, i32, i32) {
    %c0_i32 = arith.constant 0 : i32
    %c0_i32_0 = arith.constant 0 : i32
    %c0_i32_1 = arith.constant 0 : i32
    return %arg0, %c0_i32, %c0_i32_0 : i32, i32, i32
  }
  func.func @transform_4(%arg0: i32) -> (i32, i32, i32) {
    %c0_i32 = arith.constant 0 : i32
    %c0_i32_0 = arith.constant 0 : i32
    %c0_i32_1 = arith.constant 0 : i32
    return %arg0, %c0_i32, %c0_i32_0 : i32, i32, i32
  }
  func.func @transform_5(%arg0: i32) -> (i32, i32, i32) {
    %c0_i32 = arith.constant 0 : i32
    %c0_i32_0 = arith.constant 0 : i32
    %c0_i32_1 = arith.constant 0 : i32
    return %arg0, %c0_i32, %c0_i32_0 : i32, i32, i32
  }
}

</mosaic_0001>

<bundles_post_ra>
// kernel: tpu_custom_call.1
= control target key start
LH: loop header
LB: loop body
LE: loop exit
PB: predicated region body
PF: predicated region fallthrough
CT: control target
= control target key end

     0   :  { %11 = vsyncpa [#allocation3], 0  ;;  %s1564_s0 = inlined_call_operand.vmem [shape: f32[4,8,32], index: 0, kind: input, shape index: {}]   ;;  %s1565_s1 = inlined_call_operand.hbm [shape: f32[4,16,32], index: 1, kind: input, shape index: {}]   ;;  %s1566_s2 = inlined_call_operand.hbm [shape: f32[4,16,32], index: 2, kind: input, shape index: {}]   ;;  %s1567_s3 = inlined_call_operand.vmem [shape: s32[4,8,1], index: 3, kind: input, shape index: {}]   ;;  %s1568_s4 = inlined_call_operand.hbm [shape: f32[4,8,32], index: 4, kind: output, shape index: {0}]   ;;  %s1569_s5 = inlined_call_operand.hbm [shape: f32[4,8,16], index: 5, kind: output, shape index: {1}]  }
   0x1   :  { %13 = vsyncpa [#allocation3 + $0x1], 0 }
   0x2   :  { %14 = vsyncpa [#allocation6], 0 }
   0x3   :  { %16 = vsyncpa [#allocation6 + $0x1], 0 }
   0x4   :  { %17 = vsyncpa [#allocation4], 0 }
   0x5   :  { %19 = vsyncpa [#allocation4 + $0x1], 0 }
   0x6   :  { %20 = vsyncpa [#allocation9], 0 }
   0x7   :  { %22 = vsyncpa [#allocation9 + $0x1], 0  ;;  %s1264_s18 = smov 0   ;;  %s1266_s19 = smov 0  }
   0x8   :  { %s1268_s20 = smov 0   ;;  %s1270_s21 = smov 0  }
   0x9 LB: > { %s1285_s22 = sadd.s32 4294967295, %s1220_s21   ;;  %s889_s23 = sadd.s32 4294967294, %s1220_s21   ;;  %s1220_s21 = sphi %s1270_s21, %s1587_s21   ;;  %s1216_s20 = sphi %s1268_s20, %s1586_s20   ;;  %s1212_s19 = sphi %s1266_s19, %s1585_s19   ;;  %s1208_s18 = sphi %s1264_s18, %s1584_s18  }
   0xa   : > { %s1289_s24 = sadd.s32 1, %s1220_s21   ;;  %s61_s25 = sadd.s32 1, %s1216_s20 }
   0xb   : > { %s58_s26 = ssub.s32 %s1220_s21, %s1289_s24  ;;  %p68_p0 = scmp.ne.s32.totalorder %s1216_s20, %s1212_s19 }
   0xc   : > { %p59_p1 = scmp.eq.s32.totalorder %s58_s26, 0  ;;  %p69_p2 = scmp.eq.s32.totalorder %s1220_s21, 0 }
   0xd   : > { %p74_p3 = scmp.ne.s32.totalorder %s1212_s19, %s1208_s18  ;;  %p75_p4 = scmp.eq.s32.totalorder %s1285_s22, 0 }
   0xe   : > { %s1301_s27 = scalar_select %p59_p1, %s1216_s20, %s61_s25  }
   0xf   : > { %p1303_p5 = por %p69_p2, %p68_p0  ;;  %p1307_p6 = por %p75_p4, %p74_p3 }
  0x10   : > { %p150_p7 = scmp.eq.s32.totalorder %s1285_s22, 1  ;;  %p156_p8 = scmp.eq.s32.totalorder %s889_s23, 1 }
  0x11   : > { %s1574_s29 = scalar_select %p1307_p6, 1, 0 }
  0x12   : > { %p1007_p10 = scmp.lt.s32.totalorder %s1220_s21, 2  ;;  %p1314_p11 = por %p150_p7, %p68_p0 }
  0x13   : > { %p1318_p12 = por %p156_p8, %p74_p3  ;;  %s1323_s7 = sand.u32 1, %s1216_s20  }
  0x14   : > { %s1575_s30 = scalar_select %p1314_p11, 1, 0 }
  0x15   : > { %s1576_s6 = scalar_select %p1318_p12, 1, 0 }
  0x16   : > { %s926_s8 = sshll.u32 %s1220_s21, 9  ;;  %s892_s9 = sshll.u32 %s1323_s7, 5 }
  0x17   : > { %s1332_s12 = scalar_lea.hbm %s1565_s1, %s926_s8  ;;  %s215_s13 = scalar_lea.vmem [#allocation2], %s892_s9 }
  0x18   : > { %s223_s14 = sshll.u32 %s215_s13, 4  ;;  %p1338_p13 = pnand %p1007_p10, %p1303_p5  ;;  %s1342_s14 = int_to_ptr.vmem [resolvable:$true] %s223_s14 }
  0x19   : > { %s212_s16 = scalar_lea.sflag [#allocation3], %s1323_s7  ;;  %s1058_s17 = scalar_lea.hbm %s1332_s12, 512 }
  0x1a   : > { %p1059_p0 = scmp.ne.s32.totalorder %s1332_s12, %s1058_s17  ;;  %p1060_p1 = pneg %p1338_p13 }
  0x1b   : > { %s1063_s26 = scalar_lea.hbm %s1565_s1, 1024  ;;  %p1064_p4 = scmp.lt.u32.totalorder %s1332_s12, %s1565_s1 }
  0x1c   : > { %p1061_p2 = pnand %p1060_p1, %p1059_p0  ;;  %p1065_p5 = scmp.lt.u32.totalorder %s1063_s26, %s1058_s17 }
  0x1d   : > { %p1067_p8 = scmp.lt.u32.totalorder %s1058_s17, %s1332_s12 }
  0x1e   : > { %p1062_p3 = pneg %p1061_p2  ;;  %p1066_p7 = por %p1065_p5, %p1064_p4 }
  0x20   : > { %p1068_p10 = por %p1067_p8, %p1066_p7 }
  0x22   : > { %p1069_p9 = pnand %p1068_p10, %p1062_p3 }
  0x24   : > { %1072 = shalt.err (!%p1069_p9)
}
  0x25   : > { %s1073_s11 = scalar_lea.vmem %s1342_s14, 512  ;;  %s1222_s13 = smov [#allocation2]  }
  0x26   : > { %p1074_p0 = scmp.ne.s32.totalorder %s1342_s14, %s1073_s11  ;;  %s1078_s23 = sshll.u32 %s1222_s13, 4  ;;  %s1079_s23 = int_to_ptr.vmem [resolvable:$false] %s1078_s23 }
  0x27   : > { %s1080_s25 = scalar_lea.vmem %s1079_s23, 1024  ;;  %p1081_p11 = scmp.lt.s32.totalorder %s1342_s14, %s1079_s23 }
  0x28   : > { %p1076_p2 = pnand %p1074_p0, %p1060_p1  ;;  %p1082_p4 = scmp.lt.s32.totalorder %s1080_s25, %s1073_s11 }
  0x2a   : > { %p1077_p12 = pneg %p1076_p2  ;;  %p1083_p5 = por %p1082_p4, %p1081_p11 }
  0x2c   : > { %p1084_p7 = pnand %p1083_p5, %p1077_p12 }
  0x2e   : > { %1087 = shalt.err (!%p1084_p7)
}
  0x2f   : > { %s1571_s17 = smov 128   ;;  %s1224_s26 = smov 8  }
  0x30   : > { %996 = dma.hbm_to_vmem [thread:$0]  (!%p1338_p13), %s1332_s12, 512, %s1342_s14, %s212_s16, %s1571_s17, %s1571_s17, %s1224_s26  }
  0x31   : > { %p900_p9 = scmp.ge.s32.totalorder %s1220_s21, 1  ;;  %p262_p11 = scmp.lt.s32.totalorder %s1220_s21, 3 }
  0x32   : > { %s1386_s13 = scalar_lea.hbm %s1566_s2, %s926_s8  ;;  %s237_s23 = scalar_lea.vmem [#allocation5], %s892_s9 }
  0x33   : > { %p1377_p12 = pnand %p900_p9, %p262_p11  ;;  %s245_s25 = sshll.u32 %s237_s23, 4  ;;  %s1390_s25 = int_to_ptr.vmem [resolvable:$true] %s245_s25 }
  0x34   : > { %s234_s12 = scalar_lea.sflag [#allocation6], %s1323_s7  ;;  %s1088_s14 = scalar_lea.hbm %s1386_s13, 512 }
  0x35   : > { %p1089_p3 = scmp.ne.s32.totalorder %s1386_s13, %s1088_s14  ;;  %s1093_s8 = scalar_lea.hbm %s1566_s2, 1024 }
  0x36   : > { %p1094_p0 = scmp.lt.u32.totalorder %s1386_s13, %s1566_s2  ;;  %p1095_p2 = scmp.lt.u32.totalorder %s1093_s8, %s1088_s14 }
  0x37   : > { %p1091_p8 = pnand %p1089_p3, %p1060_p1  ;;  %p1097_p5 = scmp.lt.u32.totalorder %s1088_s14, %s1386_s13 }
  0x38   : > { %p1096_p4 = por %p1095_p2, %p1094_p0 }
  0x39   : > { %p1092_p10 = pneg %p1091_p8 }
  0x3a   : > { %p1098_p7 = por %p1097_p5, %p1096_p4 }
  0x3c   : > { %p1099_p9 = pnand %p1098_p7, %p1092_p10 }
  0x3e   : > { %1102 = shalt.err (!%p1099_p9)
}
  0x3f   : > { %s1103_s9 = scalar_lea.vmem %s1390_s25, 512  ;;  %s1225_s23 = smov [#allocation5]  }
  0x40   : > { %p1104_p11 = scmp.ne.s32.totalorder %s1390_s25, %s1103_s9  ;;  %s1108_s16 = sshll.u32 %s1225_s23, 4  ;;  %s1109_s16 = int_to_ptr.vmem [resolvable:$false] %s1108_s16 }
  0x41   : > { %s1110_s17 = scalar_lea.vmem %s1109_s16, 1024  ;;  %p1111_p6 = scmp.lt.s32.totalorder %s1390_s25, %s1109_s16 }
  0x42   : > { %p1106_p3 = pnand %p1104_p11, %p1060_p1  ;;  %p1112_p0 = scmp.lt.s32.totalorder %s1110_s17, %s1103_s9 }
  0x44   : > { %p1107_p8 = pneg %p1106_p3  ;;  %p1113_p2 = por %p1112_p0, %p1111_p6 }
  0x46   : > { %p1114_p4 = pnand %p1113_p2, %p1107_p8 }
  0x48   : > { %1117 = shalt.err (!%p1114_p4)
}
  0x49   : > { %s1579_s14 = smov 128   ;;  %266 = sbr.rel (%p1377_p12) target bundleno = 851 (0x353), region = 36 }
  0x4a   : > { %999 = dma.hbm_to_vmem [thread:$0]  (!%p1338_p13), %s1386_s13, 512, %s1390_s25, %s234_s12, %s1579_s14, %s1579_s14, %s1224_s26  }
  0x4b   : > { %s1424_s10 = sand.u32 (!%p1377_p12), 1, %s1212_s19   ;;  %p1580_p6 = scmp.ne.s32.totalorder (!%p1377_p12), %s1574_s29, 0 }
  0x4c   : > { %s901_s8 = sshll.u32 (!%p1377_p12), %s1424_s10, 5  ;;  %s269_s11 = scalar_lea.sflag (!%p1377_p12), [#allocation3], %s1424_s10 }
  0x4d   : > { %s272_s15 = scalar_lea.vmem (!%p1377_p12), [#allocation2], %s901_s8 }
  0x50   : > { %1191 = dma.done.wait (%p1580_p6), %s269_s11, 512  }
  0x51   : > { %1193 = vsyncadd (%p1580_p6), %s269_s11, 4294966784  ;;  %s278_s7 = scalar_lea.sflag [#allocation6], %s1424_s10  ;;  %s1433_s26 = scalar_lea.vmem [#allocation5], %s901_s8 }
  0x52   : > { %1195 = dma.done.wait (%p1580_p6), %s278_s7, 512  }
  0x53   : > { %1197 = vsyncadd (%p1580_p6), %s278_s7, 4294966784  ;;  %s905_s28 = sshll.u32 %s1285_s22, 1  ;;  %v1226_v0 = vmov 0.0|0.0   ;;  %vm1227_vm0 = vmmov 0   ;;  %v1228_v1 = vmov 0.0   ;;  %vm356_vm1 = vcmask 261120  }
  0x54   : > { %971 = vmatprep.subr.bf16.mxu0 %v1226_v0  ;;  %975 = vmatprep.subr.bf16.mxu1 %v1226_v0  ;;  %p329_p13 = scmp.lt.s32.totalorder %s905_s28, 3  ;;  %v1229_v2 = vmov 0   ;;  %vm973_vm2 = vmpackc.low %vm356_vm1, %vm356_vm1  ;;  %v346_v3 = vld [vmem:[%s272_s15] sm:$0xff]  ;;  %v347_v4 = vld [vmem:[%s272_s15 + $0x8] sm:$0xff]  ;;  %v515_v15 = vlaneseq  ;;  %vm529_vm4 = vcmask 130048   ;;  %s903_s17 = sshll.u32 %s1424_s10, 4 }
  0x55   : > { %947 = vmatprep.mubr.msk.f32.mxu0 %vm1227_vm0, %v1228_v1  ;;  %954 = vmatprep.mubr.msk.f32.mxu1 %vm1227_vm0, %v1228_v1  ;;  %v348_v5 = vld [vmem:[%s272_s15 + $0x10] sm:$0xff]  ;;  %v972_v6 = vpack.c.bf16 %v347_v4, %v346_v3  ;;  %v349_v7 = vld [vmem:[%s272_s15 + $0x18] sm:$0xff]  ;;  %v350_v37 = vld [vmem:[%s1433_s26] sm:$0xff]  ;;  %s327_s14 = scalar_lea.vmem [#allocation8], %s903_s17  ;;  %s929_s11 = sshll.u32 %s1285_s22, 8 }
  0x56   : > { %s1589_s28 = smov (!%p329_p13, %s905_s28), 3  ;;  %1049 = vset.pattern.permute.xlu0 %v1229_v2  ;;  %v976_v8 = vpack.c.bf16 %v349_v7, %v348_v5  ;;  %v516_v17 = vand.u32 127, %v515_v15  ;;  %v351_v38 = vld [vmem:[%s1433_s26 + $0x8] sm:$0xff]  ;;  %v352_v40 = vld [vmem:[%s1433_s26 + $0x10] sm:$0xff]  ;;  %v353_v41 = vld [vmem:[%s1433_s26 + $0x18] sm:$0xff]  ;;  %s737_s8 = sshll.u32 %s327_s14, 4  ;;  %s1470_s8 = int_to_ptr.vmem [resolvable:$true] %s737_s8 }
  0x57   : > { %s906_s13 = sshll.u32 %s1589_s28, 3  ;;  %974 = vmatpush3.bf16.xpose.msk.msra.mxu0 %vm973_vm2, %v972_v6  ;;  %v980_v39 = vpack.c.bf16 %v351_v38, %v350_v37  ;;  %v983_v42 = vpack.c.bf16 %v353_v41, %v352_v40  ;;  %s1477_s26 = scalar_lea.hbm %s1569_s5, %s929_s11 }
  0x58   : > { %s340_s12 = scalar_lea.vmem %s1567_s3, %s906_s13  ;;  %s332_s16 = scalar_lea.vmem %s1564_s0, %s906_s13  ;;  %978 = vmatpush3.bf16.xpose.msk.msra.mxu1 %vm973_vm2, %v976_v8  ;;  %979 = vmatprep.subr.bf16.mxu0 %v1226_v0 }
  0x59   : > { %v517_v9 = vld [vmem:[%s340_s12] sm:$0xff]  ;;  %v345_v11 = vld [vmem:[%s332_s16 + $0x8] sm:$0xff]  ;;  %982 = vmatprep.subr.bf16.mxu1 %v1226_v0  ;;  %s708_s28 = scalar_lea.sflag [#allocation9], %s1424_s10  ;;  %s1118_s13 = scalar_lea.vmem %s1470_s8, 256 }
  0x5a   : > { %v344_v10 = vld [vmem:[%s332_s16] sm:$0xff]  ;;  %520 = vperm.xlu0 %1049, %v517_v9   ;;  %v518_v12 = vld [vmem:[%s340_s12 + $0x8] sm:$0xff]  ;;  %v355_v14 = vmul.f32 0.17677669, %v345_v11  ;;  %p1119_p1 = scmp.ne.s32.totalorder %s1470_s8, %s1118_s13  ;;  %p1581_p12 = scmp.ne.s32.totalorder %s1575_s30, 0 }
  0x5b   : > { %v354_v13 = vmul.f32 0.17677669, %v344_v10  ;;  %s1230_s29 = smov [#allocation8]  }
  0x5c   : > { %p1120_p10 = pnand %p1119_p1, %p1581_p12  ;;  %s1122_s25 = sshll.u32 %s1230_s29, 4  ;;  %s1123_s25 = int_to_ptr.vmem [resolvable:$false] %s1122_s25 }
  0x5d   : > { %s1124_s12 = scalar_lea.vmem %s1123_s25, 512  ;;  %p1125_p7 = scmp.lt.s32.totalorder %s1470_s8, %s1123_s25 }
  0x5e   : > { %523 = vperm.xlu0 %1049, %v518_v12   ;;  %948 = vmatmul.mubr.msk.f32.vlgmr.msra.gmra.mrb[0].mxu0 %vm356_vm1, %v354_v13  ;;  %p1121_p5 = pneg %p1120_p10  ;;  %p1126_p9 = scmp.lt.s32.totalorder %s1124_s12, %s1118_s13 }
  0x5f   : > { %955 = vmatmul.mubr.msk.f32.vlgmr.msra.gmra.mrb[0].mxu1 %vm356_vm1, %v355_v14  ;;  %961 = vmatprep.mubr.msk.f32.mxu0 %vm1227_vm0, %v1228_v1 }
  0x60   : > { %968 = vmatprep.mubr.msk.f32.mxu1 %vm1227_vm0, %v1228_v1  ;;  %981 = vmatpush3.bf16.msra.mxu0 %v980_v39  ;;  %p1127_p11 = por %p1126_p9, %p1125_p7 }
  0x61   : > { %984 = vmatpush3.bf16.msra.mxu1 %v983_v42 }
  0x62   : > { %p1128_p3 = pnand %p1127_p11, %p1121_p5 }
  0xd9   : > { %v521_v16 = vpop.permute.xlu0 %520 }
  0xda   : > { %vm525_vm3 = vcmp.lt.s32.totalorder %v516_v17, %v521_v16 }
  0xdd   : > { %v524_v18 = vpop.permute.xlu0 %523 }
  0xde   : > { %vm526_vm5 = vcmp.lt.s32.totalorder %v516_v17, %v524_v18 }
 0x131   : > { %v432_v19 = vpop.f32.mrb[0].mxu0 }
 0x132   : > { %v527_v20 = vsel %vm525_vm3, %v432_v19, -1000000.0  ;;  %v511_v21 = vpop.f32.mrb[0].mxu1  ;;  %v949_v22 = vpop.f32.mrb[1].mxu0 }
 0x133   : > { %v530_v23 = vsel %vm529_vm4, %v527_v20, -inf  ;;  %v956_v24 = vpop.f32.mrb[1].mxu1  ;;  %v528_v25 = vsel %vm526_vm5, %v511_v21, -1000000.0 }
 0x134   : > { %531 = vmax.xlane.f32.xlu1 %v530_v23  ;;  %v533_v26 = vsel %vm529_vm4, %v528_v25, -inf }
 0x138   : > { %534 = vmax.xlane.f32.xlu1 %v533_v26 }
 0x1c1   : > { %v532_v27 = vpop.xlane.xlu1 %531 }
 0x1c2   : > { %v536_v28 = vsub.f32 %v527_v20, %v532_v27 }
 0x1c4   : > { %v538_v29 = vmul.f32 1.442695, %v536_v28 }
 0x1c5   : > { %v535_v30 = vpop.xlane.xlu1 %534 }
 0x1c6   : > { %1050 = vpow2.f32 %v538_v29  ;;  %v537_v31 = vsub.f32 %v528_v25, %v535_v30 }
 0x1c8   : > { %v540_v32 = vmul.f32 1.442695, %v537_v31 }
 0x1ca   : > { %1052 = vpow2.f32 %v540_v32 }
 0x1d0   : > { %v1051_v33 = vpop.eup %1050 }
 0x1d1   : > { %v542_v34 = vsel %vm529_vm4, %v1051_v33, 0.0 }
 0x1d2   : > { %543 = vadd.xlane.f32.xlu0 %v542_v34 }
 0x1d4   : > { %v1053_v35 = vpop.eup %1052 }
 0x1d5   : > { %v545_v36 = vsel %vm529_vm4, %v1053_v35, 0.0 }
 0x1d6   : > { %546 = vadd.xlane.f32.xlu1 %v545_v36 }
 0x25f   : > { %v544_v43 = vpop.xlane.xlu0 %543 }
 0x260   : > { %1054 = vrcp.f32 %v544_v43 }
 0x263   : > { %v547_v44 = vpop.xlane.xlu1 %546 }
 0x264   : > { %1056 = vrcp.f32 %v547_v44 }
 0x26a   : > { %v1055_v45 = vpop.eup %1054 }
 0x26b   : > { %v550_v46 = vmul.f32 %v1055_v45, %v1051_v33 }
 0x26d   : > { %962 = vmatmul.mubr.msk.f32.vlgmr.msra.gmra.mrb[2].mxu0 %vm529_vm4, %v550_v46  ;;  %552 = vst.msk [vmem:[%s327_s14] sm:$0xff] %vm529_vm4, %v550_v46 }
 0x26e   : > { %v1057_v47 = vpop.eup %1056 }
 0x26f   : > { %v551_v48 = vmul.f32 %v1057_v47, %v1053_v35 }
 0x271   : > { %969 = vmatmul.mubr.msk.f32.vlgmr.msra.gmra.mrb[2].mxu1 %vm529_vm4, %v551_v48  ;;  %553 = vst.msk [vmem:[%s327_s14 + $0x8] sm:$0xff] %vm529_vm4, %v551_v48 }
 0x272   : > { %1131 = shalt.err (!%p1128_p3)
}
 0x273   : > { %s1132_s9 = scalar_lea.hbm %s1477_s26, 256  ;;  %s1136_s14 = scalar_lea.hbm %s1569_s5, 512 }
 0x274   : > { %p1133_p8 = scmp.ne.s32.totalorder %s1477_s26, %s1132_s9  ;;  %p1137_p4 = scmp.lt.u32.totalorder %s1477_s26, %s1569_s5 }
 0x275   : > { %p1138_p6 = scmp.lt.u32.totalorder %s1136_s14, %s1132_s9  ;;  %p1140_p1 = scmp.lt.u32.totalorder %s1132_s9, %s1477_s26 }
 0x276   : > { %p1134_p0 = pnand %p1133_p8, %p1581_p12 }
 0x277   : > { %p1139_p13 = por %p1138_p6, %p1137_p4 }
 0x278   : > { %p1135_p2 = pneg %p1134_p0 }
 0x279   : > { %p1141_p10 = por %p1140_p1, %p1139_p13 }
 0x27b   : > { %p1142_p5 = pnand %p1141_p10, %p1135_p2 }
 0x27d   : > { %1145 = shalt.err (!%p1142_p5)
}
 0x27e   : > { %s1231_s13 = smov 128   ;;  %s1232_s29 = smov 8  }
 0x27f   : > { %990 = dma.vmem_to_hbm [thread:$0]  (%p1581_p12), %s1470_s8, 256, %s1477_s26, %s708_s28, %s1231_s13, %s1231_s13, %s1232_s29  }
 0x280   : > { %s320_s25 = scalar_lea.vmem [#allocation7], %s903_s17  ;;  %s1516_s16 = scalar_lea.hbm %s1568_s4, %s929_s11 }
 0x281   : > { %s721_s12 = sshll.u32 %s320_s25, 4  ;;  %s703_s17 = scalar_lea.sflag [#allocation4], %s1424_s10  ;;  %s1509_s12 = int_to_ptr.vmem [resolvable:$true] %s721_s12 }
 0x282   : > { %s1146_s8 = scalar_lea.vmem %s1509_s12, 256  ;;  %s1233_s26 = smov [#allocation7]  }
 0x283   : > { %p1147_p7 = scmp.ne.s32.totalorder %s1509_s12, %s1146_s8  ;;  %s1150_s22 = sshll.u32 %s1233_s26, 4  ;;  %s1151_s22 = int_to_ptr.vmem [resolvable:$false] %s1150_s22 }
 0x284   : > { %s1152_s28 = scalar_lea.vmem %s1151_s22, 512  ;;  %p1153_p3 = scmp.lt.s32.totalorder %s1509_s12, %s1151_s22 }
 0x285   : > { %p1148_p9 = pnand %p1147_p7, %p1581_p12  ;;  %p1154_p8 = scmp.lt.s32.totalorder %s1152_s28, %s1146_s8 }
 0x287   : > { %p1149_p11 = pneg %p1148_p9  ;;  %p1155_p0 = por %p1154_p8, %p1153_p3 }
 0x289   : > { %p1156_p2 = pnand %p1155_p0, %p1149_p11 }
 0x340   : > { %v623_v49 = vpop.f32.mrb[2].mxu0 }
 0x341   : > { %700 = vst.msk [vmem:[%s320_s25] sm:$0xff] %vm356_vm1, %v623_v49  ;;  %v963_v50 = vpop.f32.mrb[3].mxu0 }
 0x344   : > { %v696_v51 = vpop.f32.mrb[2].mxu1 }
 0x345   : > { %701 = vst.msk [vmem:[%s320_s25 + $0x8] sm:$0xff] %vm356_vm1, %v696_v51  ;;  %v970_v52 = vpop.f32.mrb[3].mxu1 }
 0x346   : > { %1159 = shalt.err (!%p1156_p2)
}
 0x347   : > { %s1160_s11 = scalar_lea.hbm %s1516_s16, 256  ;;  %s1164_s7 = scalar_lea.hbm %s1568_s4, 512 }
 0x348   : > { %p1161_p4 = scmp.ne.s32.totalorder %s1516_s16, %s1160_s11  ;;  %p1165_p1 = scmp.lt.u32.totalorder %s1516_s16, %s1568_s4 }
 0x349   : > { %p1166_p10 = scmp.lt.u32.totalorder %s1164_s7, %s1160_s11  ;;  %p1168_p7 = scmp.lt.u32.totalorder %s1160_s11, %s1516_s16 }
 0x34a   : > { %p1162_p6 = pnand %p1161_p4, %p1581_p12 }
 0x34b   : > { %p1167_p5 = por %p1166_p10, %p1165_p1 }
 0x34c   : > { %p1163_p13 = pneg %p1162_p6 }
 0x34d   : > { %p1169_p9 = por %p1168_p7, %p1167_p5 }
 0x34f   : > { %p1170_p11 = pnand %p1169_p9, %p1163_p13 }
 0x351   : > { %1173 = shalt.err (!%p1170_p11)
}
 0x352   : > { %989 = dma.vmem_to_hbm [thread:$0]  (%p1581_p12), %s1509_s12, 256, %s1516_s16, %s703_s17, %s1231_s13, %s1231_s13, %s1232_s29  }
 0x353 PF: > { %s752_s23 = sand.u32 1, %s1208_s18   ;;  %p1582_p3 = scmp.ne.s32.totalorder %s1576_s6, 0 }
 0x354   : > { %p1583_p8 = scmp.ge.s32.totalorder %s1220_s21, 2  ;;  %s753_s8 = scalar_lea.sflag [#allocation4], %s752_s23 }
 0x356   : > { %p1001_p0 = pnand %p1583_p8, %p1582_p3 }
 0x358   : > { %1199 = dma.done.wait (!%p1001_p0), %s753_s8, 256  }
 0x359   : > { %1201 = vsyncadd (!%p1001_p0), %s753_s8, 4294967040  ;;  %s762_s30 = scalar_lea.sflag [#allocation9], %s752_s23 }
 0x35a   : > { %1203 = dma.done.wait (!%p1001_p0), %s762_s30, 256  }
 0x35b   : > { %1205 = vsyncadd (!%p1001_p0), %s762_s30, 4294967040  ;;  %p25_p12 = scmp.ge.s32.totalorder %s1289_s24, 4   ;;  %s1584_s18 = smov %s1212_s19 }
 0x35c   : > { %s1585_s19 = smov %s1216_s20  ;;  %s1586_s20 = smov %s1301_s27 }
 0x35d   : > { %s1587_s21 = smov %s1289_s24  ;;  %27 = sbr.rel (!%p25_p12) target bundleno = 9 (0x9), region = 117 }
 0x364   :  { %767 = vsyncpa [#allocation3], 1 }
 0x365   :  { %769 = vsyncpa [#allocation3 + $0x1], 1 }
 0x366   :  { %770 = vsyncpa [#allocation6], 1 }
 0x367   :  { %772 = vsyncpa [#allocation6 + $0x1], 1 }
 0x368   :  { %773 = vsyncpa [#allocation4], 1 }
 0x369   :  { %775 = vsyncpa [#allocation4 + $0x1], 1 }
 0x36a   :  { %776 = vsyncpa [#allocation9], 1 }
 0x36b   :  { %778 = vsyncpa [#allocation9 + $0x1], 1 }

</bundles_post_ra>
